<compile_context>
chip_gen: v7x
topology: tpu7x:2x2x1
jax: 0.10.0
libtpu: 0.0.40
codegen_flags: <defaults>
</compile_context>

<pallas_src>
import functools

import jax
import jax.numpy as jnp
from jax.experimental import pallas as pl
from jax.experimental.pallas import tpu as pltpu

LN_EPS = 1e-5


def _round_up(n, m):
    return ((n + m - 1) // m) * m


def _transition_kernel(x_ref, w1_ref, b1_ref, g_ref, beta_ref,
                       w2_ref, b2_ref, mu_ref, *, inv_h):
    # fc: (TB, Din) @ (Din, Hp) + (1, Hp). bf16 MXU operands, f32 accumulation.
    h = jnp.dot(x_ref[...], w1_ref[...],
                preferred_element_type=jnp.float32) + b1_ref[...]

    # LayerNorm over the *real* layer_width lanes. Padded lanes of h are exactly
    # zero (w1 columns / b1 zero-padded), so whole-row sums equal real-lane sums;
    # divide by the true H (inv_h = 1/layer_width), not the padded lane width.
    mean = jnp.sum(h, axis=-1, keepdims=True) * inv_h
    var = jnp.sum(h * h, axis=-1, keepdims=True) * inv_h - mean * mean
    var = jnp.maximum(var, 0.0)          # guard E[x^2]-E[x]^2 cancellation -> no NaN
    h = (h - mean) * jax.lax.rsqrt(var + LN_EPS)
    h = h * g_ref[...] + beta_ref[...]   # gamma/beta zero-padded -> padded lanes stay 0

    # ReLU
    h = jnp.maximum(h, 0.0)

    # fc_mu: (TB, Hp) @ (Hp, F) + (1, F). Padded w2 rows are zero -> inert.
    mu_ref[...] = jnp.dot(h.astype(jnp.bfloat16), w2_ref[...],
                          preferred_element_type=jnp.float32) + b2_ref[...]


def _choose_batch_tile(B, block_b):
    if B >= 2 * block_b:
        return block_b
    if B <= 16:
        return _round_up(max(B, 1), 8)   # single step; block == padded array
    # Aim for exactly two grid steps so the "parallel" batch axis can shard
    # across both TensorCores on v7x; keep sublanes a multiple of 16 for clean
    # bf16 tiles.
    return _round_up((B + 1) // 2, 16)


def l2_deterministic_transition_forward(x, p, block_b=512):
    """x: (B, encoder_feature_dim + action_dim) float32. Returns (mu, None)."""
    B, din = x.shape
    din_w, h_pad = p["w1"].shape
    assert din == din_w, (din, din_w)
    feat = p["w2"].shape[1]
    h_real = p["h_real"]

    tb = _choose_batch_tile(B, block_b)
    b_pad = _round_up(B, tb)

    # Stream x in bf16 (halves the dominant input DMA); fold the cast into the
    # batch-pad op so it is not an extra standalone XLA pass.
    x_bf = x.astype(jnp.bfloat16)
    if b_pad != B:
        x_bf = jnp.zeros((b_pad, din), jnp.bfloat16).at[:B].set(x_bf)

    grid = (b_pad // tb,)
    # Grid-invariant weights/biases: constant index_map keeps them resident in
    # VMEM while x / mu are double-buffered by the Pallas pipeline.
    # TODO(synk): consider pipeline_mode=pl.Buffered(1) for these once needed;
    # at these sizes the second buffer is only a few KiB so it is left default.
    resident = lambda shape: pl.BlockSpec(shape, lambda i: (0, 0))

    flops = 2 * b_pad * (din * h_pad + h_pad * feat)
    bytes_accessed = (b_pad * din * 2                       # x (bf16)
                      + p["w1"].size * 2 + p["w2"].size * 2  # weights (bf16)
                      + (p["b1"].size + p["gamma"].size
                         + p["beta"].size + p["b2"].size) * 4
                      + b_pad * feat * 4)                    # mu (f32, un-padded)

    mu_pad = pl.pallas_call(
        functools.partial(_transition_kernel, inv_h=1.0 / float(h_real)),
        out_shape=jax.ShapeDtypeStruct((b_pad, feat), jnp.float32),
        grid=grid,
        in_specs=[
            pl.BlockSpec((tb, din), lambda i: (i, 0)),   # x: tiled over batch
            resident((din, h_pad)),                      # w1
            resident((1, h_pad)),                        # b1
            resident((1, h_pad)),                        # gamma
            resident((1, h_pad)),                        # beta
            resident((h_pad, feat)),                     # w2
            resident((1, feat)),                         # b2
        ],
        out_specs=pl.BlockSpec((tb, feat), lambda i: (i, 0)),
        compiler_params=pltpu.CompilerParams(
            dimension_semantics=("parallel",),
            vmem_limit_bytes=32 * 1024 * 1024),
        cost_estimate=pl.CostEstimate(
            flops=flops, transcendentals=b_pad, bytes_accessed=bytes_accessed),
    )(x_bf, p["w1"], p["b1"], p["gamma"], p["beta"], p["w2"], p["b2"])

    mu = mu_pad if b_pad == B else mu_pad[:B]
    sigma = None  # deterministic model: no sigma (matches PyTorch forward)
    return mu, sigma


def init_params(key, encoder_feature_dim, action_dim, layer_width):
    """Raw f32 params, shapes matching nn.Linear/LayerNorm (weights as (in, out))."""
    k1, k2, k3, k4 = jax.random.split(key, 4)
    din = encoder_feature_dim + action_dim
    lim1 = 1.0 / jnp.sqrt(din)
    lim2 = 1.0 / jnp.sqrt(layer_width)
    return {
        "w1": jax.random.uniform(k1, (din, layer_width), jnp.float32, -lim1, lim1),
        "b1": jax.random.uniform(k2, (1, layer_width), jnp.float32, -lim1, lim1),
        "gamma": jnp.ones((1, layer_width), jnp.float32),
        "beta": jnp.zeros((1, layer_width), jnp.float32),
        "w2": jax.random.uniform(k3, (layer_width, encoder_feature_dim),
                                 jnp.float32, -lim2, lim2),
        "b2": jax.random.uniform(k4, (1, encoder_feature_dim), jnp.float32,
                                 -lim2, lim2),
    }


def prepare_params(raw, encoder_feature_dim, action_dim, layer_width):
    """Kernel layout: Din un-padded, H padded to a 128 multiple, F un-padded.

    Zero padding of w1 columns / b1 / gamma / beta keeps padded h lanes at
    exactly 0 through LN + ReLU; zero-padded w2 rows make them inert in matmul #2.
    Matmul weights are bf16 (MXU operands), LN params / biases stay f32.
    """
    din = encoder_feature_dim + action_dim
    feat = encoder_feature_dim
    h_pad = _round_up(layer_width, 128)

    w1 = jnp.zeros((din, h_pad), jnp.bfloat16).at[:, :layer_width].set(
        raw["w1"].astype(jnp.bfloat16))
    b1 = jnp.zeros((1, h_pad), jnp.float32).at[:, :layer_width].set(raw["b1"])
    gamma = jnp.zeros((1, h_pad), jnp.float32).at[:, :layer_width].set(raw["gamma"])
    beta = jnp.zeros((1, h_pad), jnp.float32).at[:, :layer_width].set(raw["beta"])
    w2 = jnp.zeros((h_pad, feat), jnp.bfloat16).at[:layer_width, :].set(
        raw["w2"].astype(jnp.bfloat16))
    return {
        "w1": w1, "b1": b1, "gamma": gamma, "beta": beta,
        "w2": w2, "b2": raw["b2"],
        "h_real": layer_width, "feat": feat,
    }


def _reference(x, p):
    """Pure-f32 reference of the PyTorch forward."""
    h = x @ p["w1"] + p["b1"]
    mean = jnp.mean(h, axis=-1, keepdims=True)
    var = jnp.mean((h - mean) ** 2, axis=-1, keepdims=True)
    h = (h - mean) / jnp.sqrt(var + LN_EPS)
    h = h * p["gamma"] + p["beta"]
    h = jnp.maximum(h, 0.0)
    return h @ p["w2"] + p["b2"]


if __name__ == "__main__":
    encoder_feature_dim = 32
    action_dim = 4
    layer_width = 64
    batch = 8

    key = jax.random.PRNGKey(0)
    kx, kp = jax.random.split(key)
    x = jax.random.normal(kx, (batch, encoder_feature_dim + action_dim), jnp.float32)

    raw = init_params(kp, encoder_feature_dim, action_dim, layer_width)
    params = prepare_params(raw, encoder_feature_dim, action_dim, layer_width)

    mu, sigma = l2_deterministic_transition_forward(x, params)
    mu = jax.block_until_ready(mu)

    ref = _reference(x, raw)
    assert sigma is None
    assert mu.shape == (batch, encoder_feature_dim)
    # bf16 MXU operands with f32 accumulation -> loose tolerance vs pure-f32 ref.
    assert jnp.allclose(mu, ref, atol=5e-2, rtol=5e-2), \
        float(jnp.max(jnp.abs(mu - ref)))

    print("KERNEL_OK")
</pallas_src>

<mosaic_0001>
module attributes {stable_mosaic.version = 11 : i64} {
  func.func @_transition_kernel(%arg0: i32, %arg1: memref<8x36xbf16, #tpu.memory_space<vmem>>, %arg2: memref<36x128xbf16, #tpu.memory_space<vmem>>, %arg3: memref<1x128xf32, #tpu.memory_space<vmem>>, %arg4: memref<1x128xf32, #tpu.memory_space<vmem>>, %arg5: memref<1x128xf32, #tpu.memory_space<vmem>>, %arg6: memref<128x32xbf16, #tpu.memory_space<vmem>>, %arg7: memref<1x32xf32, #tpu.memory_space<vmem>>, %arg8: memref<8x32xf32, #tpu.memory_space<vmem>>) attributes {dimension_semantics = [#tpu.dimension_semantics<parallel>], iteration_bounds = array<i64: 1>, scalar_prefetch = 0 : i64, scratch_operands = 0 : i64, tpu.core_type = #tpu.core_type<tc>, window_params = [{transform_indices = @transform_0, window_bounds = array<i64: 8, 36>}, {pipeline_mode = #tpu.pipeline_mode<synchronous>, transform_indices = @transform_1, window_bounds = array<i64: 36, 128>}, {pipeline_mode = #tpu.pipeline_mode<synchronous>, transform_indices = @transform_2, window_bounds = array<i64: 1, 128>}, {pipeline_mode = #tpu.pipeline_mode<synchronous>, transform_indices = @transform_3, window_bounds = array<i64: 1, 128>}, {pipeline_mode = #tpu.pipeline_mode<synchronous>, transform_indices = @transform_4, window_bounds = array<i64: 1, 128>}, {pipeline_mode = #tpu.pipeline_mode<synchronous>, transform_indices = @transform_5, window_bounds = array<i64: 128, 32>}, {pipeline_mode = #tpu.pipeline_mode<synchronous>, transform_indices = @transform_6, window_bounds = array<i64: 1, 32>}, {transform_indices = @transform_7, window_bounds = array<i64: 8, 32>}]} {
    %c0 = arith.constant 0 : index
    %c0_0 = arith.constant 0 : index
    %0 = vector.load %arg1[%c0, %c0_0] : memref<8x36xbf16, #tpu.memory_space<vmem>>, vector<8x36xbf16>
    %c0_1 = arith.constant 0 : index
    %c0_2 = arith.constant 0 : index
    %1 = vector.load %arg2[%c0_1, %c0_2] : memref<36x128xbf16, #tpu.memory_space<vmem>>, vector<36x128xbf16>
    %cst = arith.constant dense<0.000000e+00> : vector<8x128xf32>
    %2 = tpu.matmul %0, %1, %cst {dimension_numbers = #tpu.dot_dimension_numbers<[1], [0], [0], [1], [0, 0, 1, 1], [], []>} : vector<8x36xbf16>, vector<36x128xbf16>, vector<8x128xf32> -> vector<8x128xf32>
    %c0_3 = arith.constant 0 : index
    %c0_4 = arith.constant 0 : index
    %3 = vector.load %arg3[%c0_3, %c0_4] : memref<1x128xf32, #tpu.memory_space<vmem>>, vector<1x128xf32>
    %4 = vector.broadcast %3 : vector<1x128xf32> to vector<8x128xf32>
    %5 = arith.addf %2, %4 : vector<8x128xf32>
    %cst_5 = arith.constant dense<0.000000e+00> : vector<8xf32>
    %6 = vector.multi_reduction <add>, %5, %cst_5 [1] : vector<8x128xf32> to vector<8xf32>
    %7 = vector.shape_cast %6 : vector<8xf32> to vector<8x1xf32>
    %cst_6 = arith.constant 1.562500e-02 : f32
    %8 = vector.broadcast %cst_6 : f32 to vector<8x1xf32>
    %9 = arith.mulf %7, %8 : vector<8x1xf32>
    %10 = arith.mulf %5, %5 : vector<8x128xf32>
    %cst_7 = arith.constant dense<0.000000e+00> : vector<8xf32>
    %11 = vector.multi_reduction <add>, %10, %cst_7 [1] : vector<8x128xf32> to vector<8xf32>
    %12 = vector.shape_cast %11 : vector<8xf32> to vector<8x1xf32>
    %cst_8 = arith.constant 1.562500e-02 : f32
    %13 = vector.broadcast %cst_8 : f32 to vector<8x1xf32>
    %14 = arith.mulf %12, %13 : vector<8x1xf32>
    %15 = arith.mulf %9, %9 : vector<8x1xf32>
    %16 = arith.subf %14, %15 : vector<8x1xf32>
    %cst_9 = arith.constant 0.000000e+00 : f32
    %17 = vector.broadcast %cst_9 : f32 to vector<8x1xf32>
    %18 = arith.maximumf %16, %17 : vector<8x1xf32>
    %19 = vector.broadcast %9 : vector<8x1xf32> to vector<8x128xf32>
    %20 = arith.subf %5, %19 : vector<8x128xf32>
    %cst_10 = arith.constant 9.99999974E-6 : f32
    %21 = vector.broadcast %cst_10 : f32 to vector<8x1xf32>
    %22 = arith.addf %18, %21 : vector<8x1xf32>
    %23 = math.rsqrt %22 : vector<8x1xf32>
    %24 = vector.broadcast %23 : vector<8x1xf32> to vector<8x128xf32>
    %25 = arith.mulf %20, %24 : vector<8x128xf32>
    %c0_11 = arith.constant 0 : index
    %c0_12 = arith.constant 0 : index
    %26 = vector.load %arg4[%c0_11, %c0_12] : memref<1x128xf32, #tpu.memory_space<vmem>>, vector<1x128xf32>
    %27 = vector.broadcast %26 : vector<1x128xf32> to vector<8x128xf32>
    %28 = arith.mulf %25, %27 : vector<8x128xf32>
    %c0_13 = arith.constant 0 : index
    %c0_14 = arith.constant 0 : index
    %29 = vector.load %arg5[%c0_13, %c0_14] : memref<1x128xf32, #tpu.memory_space<vmem>>, vector<1x128xf32>
    %30 = vector.broadcast %29 : vector<1x128xf32> to vector<8x128xf32>
    %31 = arith.addf %28, %30 : vector<8x128xf32>
    %cst_15 = arith.constant 0.000000e+00 : f32
    %32 = vector.broadcast %cst_15 : f32 to vector<8x128xf32>
    %33 = arith.maximumf %31, %32 : vector<8x128xf32>
    %34 = arith.truncf %33 : vector<8x128xf32> to vector<8x128xbf16>
    %c0_16 = arith.constant 0 : index
    %c0_17 = arith.constant 0 : index
    %35 = vector.load %arg6[%c0_16, %c0_17] : memref<128x32xbf16, #tpu.memory_space<vmem>>, vector<128x32xbf16>
    %cst_18 = arith.constant dense<0.000000e+00> : vector<8x32xf32>
    %36 = tpu.matmul %34, %35, %cst_18 {dimension_numbers = #tpu.dot_dimension_numbers<[1], [0], [0], [1], [0, 0, 1, 1], [], []>} : vector<8x128xbf16>, vector<128x32xbf16>, vector<8x32xf32> -> vector<8x32xf32>
    %c0_19 = arith.constant 0 : index
    %c0_20 = arith.constant 0 : index
    %37 = vector.load %arg7[%c0_19, %c0_20] : memref<1x32xf32, #tpu.memory_space<vmem>>, vector<1x32xf32>
    %38 = vector.broadcast %37 : vector<1x32xf32> to vector<8x32xf32>
    %39 = arith.addf %36, %38 : vector<8x32xf32>
    %c0_21 = arith.constant 0 : index
    %c0_22 = arith.constant 0 : index
    %40 = vector.load %arg8[%c0_21, %c0_22] : memref<8x32xf32, #tpu.memory_space<vmem>>, vector<8x32xf32>
    tpu.vector_store %arg8[%c0_21, %c0_22], %39 {strides = array<i32>} : memref<8x32xf32, #tpu.memory_space<vmem>>, vector<8x32xf32>,
    return
  }
  func.func @transform_0(%arg0: i32) -> (i32, i32) {
    %c0_i32 = arith.constant 0 : i32
    %c0_i32_0 = arith.constant 0 : i32
    return %arg0, %c0_i32 : i32, i32
  }
  func.func @transform_1(%arg0: i32) -> (i32, i32) {
    %c0_i32 = arith.constant 0 : i32
    %c0_i32_0 = arith.constant 0 : i32
    %c0_i32_1 = arith.constant 0 : i32
    return %c0_i32, %c0_i32_0 : i32, i32
  }
  func.func @transform_2(%arg0: i32) -> (i32, i32) {
    %c0_i32 = arith.constant 0 : i32
    %c0_i32_0 = arith.constant 0 : i32
    %c0_i32_1 = arith.constant 0 : i32
    return %c0_i32, %c0_i32_0 : i32, i32
  }
  func.func @transform_3(%arg0: i32) -> (i32, i32) {
    %c0_i32 = arith.constant 0 : i32
    %c0_i32_0 = arith.constant 0 : i32
    %c0_i32_1 = arith.constant 0 : i32
    return %c0_i32, %c0_i32_0 : i32, i32
  }
  func.func @transform_4(%arg0: i32) -> (i32, i32) {
    %c0_i32 = arith.constant 0 : i32
    %c0_i32_0 = arith.constant 0 : i32
    %c0_i32_1 = arith.constant 0 : i32
    return %c0_i32, %c0_i32_0 : i32, i32
  }
  func.func @transform_5(%arg0: i32) -> (i32, i32) {
    %c0_i32 = arith.constant 0 : i32
    %c0_i32_0 = arith.constant 0 : i32
    %c0_i32_1 = arith.constant 0 : i32
    return %c0_i32, %c0_i32_0 : i32, i32
  }
  func.func @transform_6(%arg0: i32) -> (i32, i32) {
    %c0_i32 = arith.constant 0 : i32
    %c0_i32_0 = arith.constant 0 : i32
    %c0_i32_1 = arith.constant 0 : i32
    return %c0_i32, %c0_i32_0 : i32, i32
  }
  func.func @transform_7(%arg0: i32) -> (i32, i32) {
    %c0_i32 = arith.constant 0 : i32
    %c0_i32_0 = arith.constant 0 : i32
    return %arg0, %c0_i32 : i32, i32
  }
}

</mosaic_0001>

<bundles_post_ra>
// kernel: tpu_custom_call.1
= control target key start
LH: loop header
LB: loop body
LE: loop exit
PB: predicated region body
PF: predicated region fallthrough
CT: control target
= control target key end

     0   :  { %v362_v1 = vmov 0.0   ;;  %vm60_vm0 = vcmask 1041408   ;;  %vm363_vm1 = vmmov 0   ;;  %s465_s0 = inlined_call_operand.vmem [shape: bf16[8,36], index: 0, kind: input, shape index: {}]   ;;  %s466_s1 = inlined_call_operand.vmem [shape: bf16[36,128], index: 1, kind: input, shape index: {}]   ;;  %s467_s2 = inlined_call_operand.vmem [shape: f32[1,128], index: 2, kind: input, shape index: {}]   ;;  %s468_s3 = inlined_call_operand.vmem [shape: f32[1,128], index: 3, kind: input, shape index: {}]   ;;  %s469_s4 = inlined_call_operand.vmem [shape: f32[1,128], index: 4, kind: input, shape index: {}]   ;;  %s470_s5 = inlined_call_operand.vmem [shape: bf16[128,32], index: 5, kind: input, shape index: {}]   ;;  %s471_s6 = inlined_call_operand.vmem [shape: f32[1,32], index: 6, kind: input, shape index: {}]   ;;  %s472_s7 = inlined_call_operand.hbm [shape: f32[8,32], index: 7, kind: output, shape index: {}]  }
   0x1   :  { %v325_v0 = vld [vmem:[%s466_s1] sm:$0xff]   ;;  %292 = vmatprep.subr.bf16.mxu0 %v362_v1  ;;  %v326_v2 = vld [vmem:[%s466_s1 + $0x8] sm:$0xff]   ;;  %302 = vmatprep.subr.bf16.mxu1 %v362_v1  ;;  %v327_v3 = vld [vmem:[%s466_s1 + $0x10] ss:$0 sps:$4 sm:$0x33]  }
   0x2   :  { %293 = vmatpush3.bf16.msra.mxu0 %v325_v0  ;;  %298 = vmatprep.mubr.msk.bf16.mxu0 %vm363_vm1, %v362_v1  ;;  %v62_v4 = vsel %vm60_vm0, %v327_v3, 0 }
   0x3   :  { %294 = vmatprep.subr.bf16.mxu0 %v362_v1  ;;  %318 = vmatprep.mubr.msk.bf16.mxu1 %vm363_vm1, %v362_v1 }
   0x6   :  { %295 = vmatpush3.bf16.msra.mxu0 %v326_v2 }
   0x7   :  { %296 = vmatprep.subr.bf16.mxu0 %v362_v1 }
   0x8   :  { %12 = vsyncpa [#allocation3], 0  ;;  %v28_v5 = vld [vmem:[%s465_s0] sm:$0xf]  ;;  %vm56_vm2 = vcmask 293888   ;;  %v329_v14 = vld [vmem:[%s470_s5 + $0x8] sm:$0xff]  }
   0x9   :  { %v263_v6 = vld [vmem:[%s467_s2] ss:$0 sm:$0xff]  ;;  %v330_v15 = vld [vmem:[%s470_s5 + $0x10] sm:$0xff]   ;;  %v331_v16 = vld [vmem:[%s470_s5 + $0x18] sm:$0xff]   ;;  %s364_s29 = smov [#allocation2]   ;;  %vm247_vm3 = vcmask 261120  }
   0xa   :  { %297 = vmatpush3.bf16.msra.mxu0 %v62_v4  ;;  %v328_v13 = vld [vmem:[%s470_s5] sm:$0xff]   ;;  %v333_v18 = vld [vmem:[%s470_s5 + $0x28] sm:$0xff]   ;;  %v334_v19 = vld [vmem:[%s470_s5 + $0x30] sm:$0xff]   ;;  %s255_s30 = sshll.u32 %s364_s29, 4  ;;  %s256_s30 = int_to_ptr.vmem [resolvable:$true] %s255_s30 }
   0xb   :  { %303 = vmatpush3.bf16.msra.mxu1 %v328_v13  ;;  %v332_v17 = vld [vmem:[%s470_s5 + $0x20] sm:$0xff]   ;;  %v335_v20 = vld [vmem:[%s470_s5 + $0x38] sm:$0xff]   ;;  %p343_p1 = scmp.lt.s32.totalorder %s256_s30, %s256_s30 }
   0xc   :  { %304 = vmatprep.subr.bf16.mxu1 %v362_v1  ;;  %v268_v31 = vld [vmem:[%s468_s3] ss:$0 sm:$0xff]  ;;  %s338_s3 = scalar_lea.vmem %s256_s30, 128 }
   0xd   :  { %299 = vmatmul.mubr.msk.bf16.vlgmr.msra.gmra.mrb[0].mxu0 %vm56_vm2, %v28_v5  ;;  %v269_v33 = vld [vmem:[%s469_s4] ss:$0 sm:$0xff]  ;;  %p339_p0 = scmp.ne.s32.totalorder %s256_s30, %s338_s3  ;;  %p344_p2 = scmp.lt.s32.totalorder %s338_s3, %s338_s3 }
   0xe   :  { %v270_v38 = vld [vmem:[%s471_s6] ss:$0 sm:$0xff] }
   0xf   :  { %305 = vmatpush3.bf16.msra.mxu1 %v329_v14  ;;  %p345_p3 = por %p344_p2, %p343_p1 }
  0x10   :  { %306 = vmatprep.subr.bf16.mxu1 %v362_v1 }
  0x11   :  { %p346_p4 = pnand %p345_p3, %p339_p0 }
  0x13   :  { %307 = vmatpush3.bf16.msra.mxu1 %v330_v15 }
  0x14   :  { %308 = vmatprep.subr.bf16.mxu1 %v362_v1 }
  0x17   :  { %309 = vmatpush3.bf16.msra.mxu1 %v331_v16 }
  0x18   :  { %310 = vmatprep.subr.bf16.mxu1 %v362_v1 }
  0x1b   :  { %311 = vmatpush3.bf16.msra.mxu1 %v332_v17 }
  0x1c   :  { %312 = vmatprep.subr.bf16.mxu1 %v362_v1 }
  0x1f   :  { %313 = vmatpush3.bf16.msra.mxu1 %v333_v18 }
  0x20   :  { %314 = vmatprep.subr.bf16.mxu1 %v362_v1 }
  0x23   :  { %315 = vmatpush3.bf16.msra.mxu1 %v334_v19 }
  0x24   :  { %316 = vmatprep.subr.bf16.mxu1 %v362_v1 }
  0x27   :  { %317 = vmatpush3.bf16.msra.mxu1 %v335_v20 }
  0xe0   :  { %v98_v7 = vpop.f32.mrb[0].mxu0 }
  0xe1   :  { %v99_v8 = vadd.f32 %v263_v6, %v98_v7  ;;  %v300_v9 = vpop.f32.mrb[1].mxu0 }
  0xe2   :  { %v101_v10 = vpop.f32.mrb[2].mxu0 }
  0xe3   :  { %104 = vadd.xlane.f32.xlu0 %v99_v8  ;;  %v301_v11 = vpop.f32.mrb[3].mxu0  ;;  %v107_v12 = vmul.f32 %v99_v8, %v99_v8 }
  0xe7   :  { %108 = vadd.xlane.f32.xlu0 %v107_v12 }
 0x170   :  { %v105_v21 = vpop.xlane.xlu0 %104 }
 0x171   :  { %v106_v22 = vmul.f32 0.015625, %v105_v21 }
 0x173   :  { %v111_v24 = vmul.f32 %v106_v22, %v106_v22  ;;  %v114_v29 = vsub.f32 %v99_v8, %v106_v22 }
 0x174   :  { %v109_v23 = vpop.xlane.xlu0 %108 }
 0x175   :  { %v110_v25 = vmul.f32 0.015625, %v109_v23 }
 0x177   :  { %v112_v26 = vsub.f32 %v110_v25, %v111_v24 }
 0x179   :  { %v113_v27 = vmax.f32 %v112_v26, 0.0 }
 0x17b   :  { %v115_v28 = vadd.f32 1e-05, %v113_v27 }
 0x17d   :  { %336 = vrsqrt.f32 %v115_v28 }
 0x187   :  { %v337_v30 = vpop.eup %336 }
 0x188   :  { %v117_v32 = vmul.f32 %v337_v30, %v114_v29 }
 0x18a   :  { %v125_v34 = vmul.f32 %v268_v31, %v117_v32 }
 0x18c   :  { %v133_v35 = vadd.f32 %v269_v33, %v125_v34 }
 0x18e   :  { %v134_v36 = vmax.f32 %v133_v35, 0.0 }
 0x190   :  { %v135_v37 = vpack.c.bf16 %v134_v36, %v134_v36 }
 0x192   :  { %319 = vmatmul.mubr.bf16.vlgmr.msra.gmra.mrb[0].mxu1 %v135_v37 }
 0x265   :  { %v241_v39 = vpop.f32.mrb[0].mxu1 }
 0x266   :  { %v242_v40 = vadd.f32 %v270_v38, %v241_v39  ;;  %v320_v41 = vpop.f32.mrb[1].mxu1 }
 0x267   :  { %v244_v42 = vpop.f32.mrb[2].mxu1 }
 0x268   :  { %v321_v43 = vpop.f32.mrb[3].mxu1  ;;  %248 = vst.msk [vmem:[#allocation2] sm:$0xff] %vm247_vm3, %v242_v40 }
 0x269   :  { %349 = shalt.err (!%p346_p4)
}
 0x26a   :  { %s350_s6 = scalar_lea.hbm %s472_s7, 128 }
 0x26b   :  { %p351_p5 = scmp.ne.s32.totalorder %s472_s7, %s350_s6  ;;  %p354_p6 = scmp.lt.u32.totalorder %s350_s6, %s472_s7 }
 0x26d   :  { %p356_p7 = pnand %p354_p6, %p351_p5 }
 0x26f   :  { %359 = shalt.err (!%p356_p7)
}
 0x270   :  { %258 = dma.vmem_to_hbm [thread:$0]  %s256_s30, 128, %s472_s7, [#allocation3]  }
 0x271   :  { %360 = dma.done.wait [#allocation3], 128  }
 0x272   :  { %361 = vsyncadd [#allocation3], 4294967168 }
 0x273   :  { %262 = vsyncpa [#allocation3], 1 }

</bundles_post_ra>
